<compile_context>
chip_gen: v7x
topology: tpu7x:2x2x1
jax: 0.10.0
libtpu: 0.0.40
codegen_flags: <defaults>
</compile_context>

<pallas_src>
import jax
import jax.numpy as jnp
from jax.experimental import pallas as pl
from jax.experimental.pallas import tpu as pltpu
import numpy as np


def make_bilstm_kernel(num_layers, hidden, d_max, out_pad, w_pack):
    """Fused BiLSTM (seq_len == 1, h0 = c0 = 0) + FC head in one kernel body.

    Load-bearing assumptions from the PyTorch module: seq_len == 1 and
    h0 = c0 = 0, so the recurrent term (W_hh @ h0) and the f-gate contribution
    (f * c0) are identically zero and are omitted.  Do NOT reuse this kernel
    for seq_len > 1 or a non-zero initial state.
    """
    H = hidden
    h2 = 2 * H          # per-direction concat width (= i/o/g block width)
    gh = 6 * H          # live fused gate width

    def kernel(x_ref, w_ref, b_ref, out_ref):
        mm_dtype = w_ref.dtype                           # f32 or bf16 weights
        h = x_ref[...]                                   # (B, d_max), f32

        def widen(v):
            # Zero-pad the tiny activation back to d_max instead of row-slicing
            # the weight slab (which could materialize a large VMEM copy).
            if v.shape[1] == d_max:
                return v
            pad = jnp.zeros((v.shape[0], d_max - v.shape[1]), v.dtype)
            return jnp.concatenate([v, pad], axis=-1)

        for layer in range(num_layers):
            gates = jnp.dot(widen(h).astype(mm_dtype), w_ref[layer],
                            preferred_element_type=jnp.float32) + b_ref[layer]
            # i/o columns were pre-scaled by 0.5, so one tanh over the whole
            # gate tensor covers both the sigmoid (0.5*t + 0.5) and g gates.
            t = jnp.tanh(gates if w_pack == gh else gates[:, :gh])
            sig = 0.5 * t[:, :2 * h2] + 0.5              # [i_f|i_b|o_f|o_b]
            i_blk = sig[:, :h2]
            o_blk = sig[:, h2:]
            g_blk = t[:, 2 * h2:gh]
            # c = i * g (c0 == 0);  h = o * tanh(c), already [fwd | bwd]
            h = o_blk * jnp.tanh(i_blk * g_blk)          # (B, 2H), f32
            # TODO(synk): inter-layer dropout (p=0.2) only applies in training
            # mode; eval-mode forward (no dropout) is reproduced here.

        # FC head stored as slab index num_layers (zero-padded columns/rows).
        fc = jnp.dot(widen(h).astype(mm_dtype), w_ref[num_layers],
                     preferred_element_type=jnp.float32)
        # lane-dense (128-multiple) final store; wrapper slices to output_size
        out_ref[...] = fc[:, :out_pad] + b_ref[num_layers][:, :out_pad]

    return kernel


def bilstm_forward_pallas(x, params, num_layers, hidden, output_size):
    """x: (batch, input_size) float32.

    Hard-codes the module's forward: sequence length 1 (x.unsqueeze(1)) and
    zero initial hidden/cell state.  For throughput, callers should stack as
    many independent inputs as possible along the batch dim (ideally >=128)
    before calling - per-call cost here is almost entirely launch + DMA
    prologue, and the MXU M dimension is nearly empty at small batch.
    """
    assert x.ndim == 2, "expected (batch, input_size); the module adds seq dim"
    batch, in_dim = x.shape
    h2 = 2 * hidden
    d_max = max(in_dim, h2)
    w_packed = params["w_packed"]
    b_packed = params["b_packed"]
    assert w_packed.shape[0] == num_layers + 1 and w_packed.shape[1] == d_max
    w_pack = w_packed.shape[2]
    out_pad = ((output_size + 127) // 128) * 128
    assert out_pad <= w_pack

    if in_dim < d_max:
        # zero-pad the input features so layer 0's weight (also zero-padded
        # rows) can live in the same packed slab as the deeper layers.
        x = jnp.pad(x, ((0, 0), (0, d_max - in_dim)))

    vmem = pl.BlockSpec(memory_space=pltpu.MemorySpace.VMEM)
    out = pl.pallas_call(
        make_bilstm_kernel(num_layers, hidden, d_max, out_pad, w_pack),
        out_shape=jax.ShapeDtypeStruct((batch, out_pad), jnp.float32),
        in_specs=[vmem, vmem, vmem],
        out_specs=vmem,
    )(x, w_packed, b_packed)
    return out[:, :output_size]


def init_params(key, input_size, hidden, num_layers, output_size,
                weights_dtype=jnp.float32):
    """Builds (a) packed/fused kernel params and (b) raw per-direction params
    for the pure-JAX reference (so the fusion/re-layout is validated too).

    Offline fusion:
      * both directions of each layer fused into one (d_max, 6H) slab with
        column layout [i_f|i_b|o_f|o_b|g_f|g_b] (dead f-gate dropped),
      * i/o weight+bias columns pre-scaled by 0.5 (sigmoid-via-tanh),
      * the FC head appended as slab index num_layers,
    so the kernel sees exactly 3 operands.  Init mimics PyTorch's
    uniform(-1/sqrt(H), 1/sqrt(H)).  W_hh is not sampled because it never
    contributes (h0 = 0, seq_len = 1); the forward math is identical, only the
    RNG stream differs from a real PyTorch init.
    """
    H = hidden
    H2 = 2 * H
    D_max = max(input_size, H2)
    OUT_PAD = ((output_size + 127) // 128) * 128
    W_PACK = max(6 * H, OUT_PAD)
    k_lstm = 1.0 / np.sqrt(H)

    raw = []
    w_slabs, b_slabs = [], []
    in_dim = input_size
    # (pytorch gate row, fused dest block, scale): i->0, o->1, g->2; f dropped
    gate_map = [(0, 0, 0.5), (3, 1, 0.5), (2, 2, 1.0)]
    for _layer in range(num_layers):
        w_fused = np.zeros((D_max, W_PACK), dtype=np.float32)
        b_fused = np.zeros((1, W_PACK), dtype=np.float32)
        for d in range(2):                    # 0 = forward, 1 = backward
            key, k1, k2, k3 = jax.random.split(key, 4)
            w_ih = jax.random.uniform(k1, (4 * H, in_dim),
                                      minval=-k_lstm, maxval=k_lstm,
                                      dtype=jnp.float32)
            b_ih = jax.random.uniform(k2, (4 * H,),
                                      minval=-k_lstm, maxval=k_lstm,
                                      dtype=jnp.float32)
            b_hh = jax.random.uniform(k3, (4 * H,),
                                      minval=-k_lstm, maxval=k_lstm,
                                      dtype=jnp.float32)
            b_sum = b_ih + b_hh
            raw.extend([w_ih, b_sum])
            w_np = np.asarray(w_ih)
            b_np = np.asarray(b_sum)
            for src, dst, scale in gate_map:
                col0 = dst * H2 + d * H
                w_fused[:in_dim, col0:col0 + H] = (
                    scale * w_np[src * H:(src + 1) * H, :].T)
                b_fused[0, col0:col0 + H] = scale * b_np[src * H:(src + 1) * H]
        w_slabs.append(w_fused)
        b_slabs.append(b_fused)
        in_dim = H2

    k_fc = 1.0 / np.sqrt(H2)
    key, k1, k2 = jax.random.split(key, 3)
    fc_w = jax.random.uniform(k1, (output_size, H2),
                              minval=-k_fc, maxval=k_fc, dtype=jnp.float32)
    fc_b = jax.random.uniform(k2, (output_size,),
                              minval=-k_fc, maxval=k_fc, dtype=jnp.float32)
    raw.extend([fc_w, fc_b])

    w_fc = np.zeros((D_max, W_PACK), dtype=np.float32)
    w_fc[:H2, :output_size] = np.asarray(fc_w).T
    b_fc = np.zeros((1, W_PACK), dtype=np.float32)
    b_fc[0, :output_size] = np.asarray(fc_b)
    w_slabs.append(w_fc)
    b_slabs.append(b_fc)

    params = {
        "w_packed": jnp.asarray(np.stack(w_slabs), dtype=weights_dtype),
        "b_packed": jnp.asarray(np.stack(b_slabs)),   # biases stay f32
    }
    return params, raw


def bilstm_forward_ref(x, raw, num_layers, hidden):
    """Pure-JAX reference using the UNfused per-direction weights and
    jax.nn.sigmoid (validates the gate re-layout and sigmoid-via-tanh trick)."""
    H = hidden
    h_in = x
    idx = 0
    for _layer in range(num_layers):
        hs = []
        for _d in range(2):
            w_ih, b = raw[idx], raw[idx + 1]
            idx += 2
            gates = h_in @ w_ih.T + b
            i = jax.nn.sigmoid(gates[:, :H])
            g = jnp.tanh(gates[:, 2 * H:3 * H])
            o = jax.nn.sigmoid(gates[:, 3 * H:])
            hs.append(o * jnp.tanh(i * g))             # c = i*g (c0 == 0)
        h_in = jnp.concatenate(hs, axis=-1)            # [fwd, bwd]
    fc_w, fc_b = raw[idx], raw[idx + 1]
    return h_in @ fc_w.T + fc_b


if __name__ == "__main__":
    def run_case(input_size, hidden, num_layers, output_size, batch,
                 weights_dtype, tol):
        key = jax.random.PRNGKey(0)
        key, xk = jax.random.split(key)
        x = jax.random.normal(xk, (batch, input_size), dtype=jnp.float32)
        params, raw = init_params(key, input_size, hidden, num_layers,
                                  output_size, weights_dtype=weights_dtype)
        out = bilstm_forward_pallas(x, params, num_layers, hidden, output_size)
        out = jax.block_until_ready(out)
        ref = bilstm_forward_ref(x, raw, num_layers, hidden)
        np.testing.assert_allclose(np.asarray(out), np.asarray(ref),
                                   rtol=tol, atol=tol)

    # Main config (input_size < 2*hidden), exact f32 weights.
    run_case(input_size=16, hidden=32, num_layers=2, output_size=8, batch=8,
             weights_dtype=jnp.float32, tol=1e-5)
    # input_size > 2*hidden path (activation zero-padded back to d_max).
    run_case(input_size=160, hidden=32, num_layers=2, output_size=8, batch=8,
             weights_dtype=jnp.float32, tol=1e-5)
    # bf16 MXU-operand weights (v6e/v7x fast path); accumulate + gates in f32.
    run_case(input_size=16, hidden=32, num_layers=2, output_size=8, batch=8,
             weights_dtype=jnp.bfloat16, tol=2e-2)

    print("KERNEL_OK")
</pallas_src>

<mosaic_0001>
module attributes {stable_mosaic.version = 11 : i64} {
  func.func @kernel(%arg0: memref<8x64xf32, #tpu.memory_space<vmem>>, %arg1: memref<3x64x192xf32, #tpu.memory_space<vmem>>, %arg2: memref<3x1x192xf32, #tpu.memory_space<vmem>>, %arg3: memref<8x128xf32, #tpu.memory_space<vmem>>) attributes {dimension_semantics = [], scalar_prefetch = 0 : i64, scratch_operands = 0 : i64, tpu.core_type = #tpu.core_type<tc>} {
    %c0 = arith.constant 0 : index
    %c0_0 = arith.constant 0 : index
    %0 = vector.load %arg0[%c0, %c0_0] : memref<8x64xf32, #tpu.memory_space<vmem>>, vector<8x64xf32>
    %c0_1 = arith.constant 0 : index
    %c0_2 = arith.constant 0 : index
    %c0_3 = arith.constant 0 : index
    %1 = vector.load %arg1[%c0_1, %c0_2, %c0_3] : memref<3x64x192xf32, #tpu.memory_space<vmem>>, vector<1x64x192xf32>
    %2 = vector.shape_cast %1 : vector<1x64x192xf32> to vector<64x192xf32>
    %cst = arith.constant dense<0.000000e+00> : vector<8x192xf32>
    %3 = tpu.matmul %0, %2, %cst {dimension_numbers = #tpu.dot_dimension_numbers<[1], [0], [0], [1], [0, 0, 1, 1], [], []>} : vector<8x64xf32>, vector<64x192xf32>, vector<8x192xf32> -> vector<8x192xf32>
    %c0_4 = arith.constant 0 : index
    %c0_5 = arith.constant 0 : index
    %c0_6 = arith.constant 0 : index
    %4 = vector.load %arg2[%c0_4, %c0_5, %c0_6] : memref<3x1x192xf32, #tpu.memory_space<vmem>>, vector<1x1x192xf32>
    %5 = vector.shape_cast %4 : vector<1x1x192xf32> to vector<1x192xf32>
    %6 = vector.broadcast %5 : vector<1x192xf32> to vector<8x192xf32>
    %7 = arith.addf %3, %6 : vector<8x192xf32>
    %8 = math.tanh %7 : vector<8x192xf32>
    %9 = vector.extract_strided_slice %8 {offsets = [0, 0], sizes = [8, 128], strides = [1, 1]} : vector<8x192xf32> to vector<8x128xf32>
    %cst_7 = arith.constant 5.000000e-01 : f32
    %10 = vector.broadcast %cst_7 : f32 to vector<8x128xf32>
    %11 = arith.mulf %10, %9 : vector<8x128xf32>
    %cst_8 = arith.constant 5.000000e-01 : f32
    %12 = vector.broadcast %cst_8 : f32 to vector<8x128xf32>
    %13 = arith.addf %11, %12 : vector<8x128xf32>
    %14 = vector.extract_strided_slice %13 {offsets = [0, 0], sizes = [8, 64], strides = [1, 1]} : vector<8x128xf32> to vector<8x64xf32>
    %15 = vector.extract_strided_slice %13 {offsets = [0, 64], sizes = [8, 64], strides = [1, 1]} : vector<8x128xf32> to vector<8x64xf32>
    %16 = vector.extract_strided_slice %8 {offsets = [0, 128], sizes = [8, 64], strides = [1, 1]} : vector<8x192xf32> to vector<8x64xf32>
    %17 = arith.mulf %14, %16 : vector<8x64xf32>
    %18 = math.tanh %17 : vector<8x64xf32>
    %19 = arith.mulf %15, %18 : vector<8x64xf32>
    %c1 = arith.constant 1 : index
    %c0_9 = arith.constant 0 : index
    %c0_10 = arith.constant 0 : index
    %20 = vector.load %arg1[%c1, %c0_9, %c0_10] : memref<3x64x192xf32, #tpu.memory_space<vmem>>, vector<1x64x192xf32>
    %21 = vector.shape_cast %20 : vector<1x64x192xf32> to vector<64x192xf32>
    %cst_11 = arith.constant dense<0.000000e+00> : vector<8x192xf32>
    %22 = tpu.matmul %19, %21, %cst_11 {dimension_numbers = #tpu.dot_dimension_numbers<[1], [0], [0], [1], [0, 0, 1, 1], [], []>} : vector<8x64xf32>, vector<64x192xf32>, vector<8x192xf32> -> vector<8x192xf32>
    %c1_12 = arith.constant 1 : index
    %c0_13 = arith.constant 0 : index
    %c0_14 = arith.constant 0 : index
    %23 = vector.load %arg2[%c1_12, %c0_13, %c0_14] : memref<3x1x192xf32, #tpu.memory_space<vmem>>, vector<1x1x192xf32>
    %24 = vector.shape_cast %23 : vector<1x1x192xf32> to vector<1x192xf32>
    %25 = vector.broadcast %24 : vector<1x192xf32> to vector<8x192xf32>
    %26 = arith.addf %22, %25 : vector<8x192xf32>
    %27 = math.tanh %26 : vector<8x192xf32>
    %28 = vector.extract_strided_slice %27 {offsets = [0, 0], sizes = [8, 128], strides = [1, 1]} : vector<8x192xf32> to vector<8x128xf32>
    %cst_15 = arith.constant 5.000000e-01 : f32
    %29 = vector.broadcast %cst_15 : f32 to vector<8x128xf32>
    %30 = arith.mulf %29, %28 : vector<8x128xf32>
    %cst_16 = arith.constant 5.000000e-01 : f32
    %31 = vector.broadcast %cst_16 : f32 to vector<8x128xf32>
    %32 = arith.addf %30, %31 : vector<8x128xf32>
    %33 = vector.extract_strided_slice %32 {offsets = [0, 0], sizes = [8, 64], strides = [1, 1]} : vector<8x128xf32> to vector<8x64xf32>
    %34 = vector.extract_strided_slice %32 {offsets = [0, 64], sizes = [8, 64], strides = [1, 1]} : vector<8x128xf32> to vector<8x64xf32>
    %35 = vector.extract_strided_slice %27 {offsets = [0, 128], sizes = [8, 64], strides = [1, 1]} : vector<8x192xf32> to vector<8x64xf32>
    %36 = arith.mulf %33, %35 : vector<8x64xf32>
    %37 = math.tanh %36 : vector<8x64xf32>
    %38 = arith.mulf %34, %37 : vector<8x64xf32>
    %c2 = arith.constant 2 : index
    %c0_17 = arith.constant 0 : index
    %c0_18 = arith.constant 0 : index
    %39 = vector.load %arg1[%c2, %c0_17, %c0_18] : memref<3x64x192xf32, #tpu.memory_space<vmem>>, vector<1x64x192xf32>
    %40 = vector.shape_cast %39 : vector<1x64x192xf32> to vector<64x192xf32>
    %cst_19 = arith.constant dense<0.000000e+00> : vector<8x192xf32>
    %41 = tpu.matmul %38, %40, %cst_19 {dimension_numbers = #tpu.dot_dimension_numbers<[1], [0], [0], [1], [0, 0, 1, 1], [], []>} : vector<8x64xf32>, vector<64x192xf32>, vector<8x192xf32> -> vector<8x192xf32>
    %42 = vector.extract_strided_slice %41 {offsets = [0, 0], sizes = [8, 128], strides = [1, 1]} : vector<8x192xf32> to vector<8x128xf32>
    %c2_20 = arith.constant 2 : index
    %c0_21 = arith.constant 0 : index
    %c0_22 = arith.constant 0 : index
    %43 = vector.load %arg2[%c2_20, %c0_21, %c0_22] : memref<3x1x192xf32, #tpu.memory_space<vmem>>, vector<1x1x192xf32>
    %44 = vector.shape_cast %43 : vector<1x1x192xf32> to vector<1x192xf32>
    %45 = vector.extract_strided_slice %44 {offsets = [0, 0], sizes = [1, 128], strides = [1, 1]} : vector<1x192xf32> to vector<1x128xf32>
    %46 = vector.broadcast %45 : vector<1x128xf32> to vector<8x128xf32>
    %47 = arith.addf %42, %46 : vector<8x128xf32>
    %c0_23 = arith.constant 0 : index
    %c0_24 = arith.constant 0 : index
    %48 = vector.load %arg3[%c0_23, %c0_24] : memref<8x128xf32, #tpu.memory_space<vmem>>, vector<8x128xf32>
    tpu.vector_store %arg3[%c0_23, %c0_24], %47 {strides = array<i32>} : memref<8x128xf32, #tpu.memory_space<vmem>>, vector<8x128xf32>,
    return
  }
}

</mosaic_0001>

<bundles_post_ra>
// kernel: tpu_custom_call.1
= control target key start
LH: loop header
LB: loop body
LE: loop exit
PB: predicated region body
PF: predicated region fallthrough
CT: control target
= control target key end

     0   :  { %8 = vsyncpa [#allocation3], 0  ;;  %s626_s0 = inlined_call_operand.hbm [shape: f32[8,64], index: 0, kind: input, shape index: {}]   ;;  %s627_s1 = inlined_call_operand.hbm [shape: f32[3,64,192], index: 1, kind: input, shape index: {}]   ;;  %s628_s2 = inlined_call_operand.vmem [shape: f32[3,1,192], index: 2, kind: input, shape index: {}]   ;;  %s629_s3 = inlined_call_operand.hbm [shape: f32[8,128], index: 3, kind: output, shape index: {}]  }
   0x1   :  { %9 = vsyncpa [#allocation6], 0 }
   0x2   :  { %10 = vsyncpa [#allocation4], 0  ;;  %s535_s12 = smov [#allocation2]   ;;  %s536_s14 = smov [#allocation5]  }
   0x3   :  { %s17_s13 = sshll.u32 %s535_s12, 4  ;;  %s26_s15 = sshll.u32 %s536_s14, 4  ;;  %s18_s13 = int_to_ptr.vmem [resolvable:$true] %s17_s13  ;;  %s562_s15 = int_to_ptr.vmem [resolvable:$true] %s26_s15 }
   0x4   :  { %s463_s18 = scalar_lea.hbm %s626_s0, 128 }
   0x5   :  { %p464_p0 = scmp.ne.s32.totalorder %s626_s0, %s463_s18  ;;  %p467_p1 = scmp.lt.u32.totalorder %s463_s18, %s626_s0 }
   0x7   :  { %p469_p2 = pnand %p467_p1, %p464_p0 }
   0x9   :  { %472 = shalt.err (!%p469_p2)
}
   0xa   :  { %s473_s23 = scalar_lea.vmem %s18_s13, 128  ;;  %p478_p4 = scmp.lt.s32.totalorder %s18_s13, %s18_s13 }
   0xb   :  { %p474_p3 = scmp.ne.s32.totalorder %s18_s13, %s473_s23  ;;  %p479_p5 = scmp.lt.s32.totalorder %s473_s23, %s473_s23 }
   0xd   :  { %p480_p6 = por %p479_p5, %p478_p4 }
   0xf   :  { %p481_p7 = pnand %p480_p6, %p474_p3 }
  0x11   :  { %484 = shalt.err (!%p481_p7)
}
  0x12   :  { %20 = dma.hbm_to_vmem [thread:$0]  %s626_s0, 128, %s18_s13, [#allocation3]  }
  0x13   :  { %s485_s28 = scalar_lea.hbm %s627_s1, 6144 }
  0x14   :  { %p486_p8 = scmp.ne.s32.totalorder %s627_s1, %s485_s28  ;;  %p489_p9 = scmp.lt.u32.totalorder %s485_s28, %s627_s1 }
  0x16   :  { %p491_p10 = pnand %p489_p9, %p486_p8 }
  0x18   :  { %494 = shalt.err (!%p491_p10)
}
  0x19   :  { %s495_s6 = scalar_lea.vmem %s562_s15, 6144  ;;  %p500_p12 = scmp.lt.s32.totalorder %s562_s15, %s562_s15 }
  0x1a   :  { %p496_p11 = scmp.ne.s32.totalorder %s562_s15, %s495_s6  ;;  %p501_p13 = scmp.lt.s32.totalorder %s495_s6, %s495_s6 }
  0x1c   :  { %p502_p0 = por %p501_p13, %p500_p12 }
  0x1e   :  { %p503_p1 = pnand %p502_p0, %p496_p11 }
  0x20   :  { %506 = shalt.err (!%p503_p1)
}
  0x21   :  { %s537_s0 = smov 256   ;;  %s538_s7 = smov 16  }
  0x22   :  { %32 = dma.hbm_to_vmem [thread:$0]  %s627_s1, 6144, %s562_s15, [#allocation6], %s537_s0, %s537_s0, %s538_s7  }
  0x23   :  { %529 = dma.done.wait [#allocation3], 128  }
  0x24   :  { %530 = vsyncadd [#allocation3], 4294967168 }
  0x25   :  { %531 = dma.done.wait [#allocation6], 6144  }
  0x26   :  { %532 = vsyncadd [#allocation6], 4294961152  ;;  %v539_v0 = vmov 0.0   ;;  %v43_v1 = vld [vmem:[#allocation5 + $0x8] sm:$0xff]  ;;  %v45_v2 = vld [vmem:[#allocation5 + $0x18] sm:$0xff]  ;;  %vm70_vm0 = vcmask 523264   ;;  %v60_v26 = vlaneseq }
  0x27   :  { %138 = vmatprep.mubr.f32.mxu0 %v539_v0  ;;  %255 = vmatprep.mubr.f32.mxu1 %v539_v0  ;;  %v42_v3 = vld [vmem:[#allocation5] sm:$0xff]  ;;  %v396_v4 = vpack.c.bf16 %v45_v2, %v43_v1  ;;  %v44_v5 = vld [vmem:[#allocation5 + $0x10] sm:$0xff]  ;;  %v47_v6 = vld [vmem:[#allocation5 + $0x28] sm:$0xff]  ;;  %s540_s11 = smov 64   ;;  %s541_s16 = smov [#allocation7]  }
  0x28   :  { %v49_v7 = vld [vmem:[#allocation5 + $0x38] sm:$0xff]  ;;  %v398_v8 = vpack.c.bf16 %v44_v5, %v42_v3  ;;  %v46_v10 = vld [vmem:[#allocation5 + $0x20] sm:$0xff]  ;;  %v48_v11 = vld [vmem:[#allocation5 + $0x30] sm:$0xff]  ;;  %v61_v27 = vshrl.u32 %v60_v26, 7  ;;  %s381_s17 = sshll.u32 %s541_s16, 4  ;;  %s382_s17 = int_to_ptr.vmem [resolvable:$true] %s381_s17 }
  0x29   :  { %v400_v9 = vpack.c.bf16 %v49_v7, %v47_v6  ;;  %v51_v12 = vld [vmem:[#allocation5 + $0x48] sm:$0xff]  ;;  %397 = vmatprep.subr.bf16.mxu0 %v396_v4  ;;  %v53_v13 = vld [vmem:[#allocation5 + $0x58] sm:$0xff]  ;;  %v402_v14 = vpack.c.bf16 %v48_v11, %v46_v10  ;;  %v50_v16 = vld [vmem:[#allocation5 + $0x40] sm:$0xff]  ;;  %s507_s18 = scalar_lea.vmem %s382_s17, 128  ;;  %p512_p3 = scmp.lt.s32.totalorder %s382_s17, %s382_s17 }
  0x2a   :  { %399 = vmatpush1.bf16.msra.mxu0 %v398_v8  ;;  %v404_v15 = vpack.c.bf16 %v53_v13, %v51_v12  ;;  %v52_v17 = vld [vmem:[#allocation5 + $0x50] sm:$0xff]  ;;  %v55_v18 = vld [vmem:[#allocation5 + $0x68] sm:$0xff]  ;;  %v57_v19 = vld [vmem:[#allocation5 + $0x78] sm:$0xff]  ;;  %v594_v28 = vsub.s32 0, %v61_v27  ;;  %v66_v30 = vsub.s32 1, %v61_v27  ;;  %p508_p2 = scmp.ne.s32.totalorder %s382_s17, %s507_s18  ;;  %p513_p4 = scmp.lt.s32.totalorder %s507_s18, %s507_s18 }
  0x2b   :  { %401 = vmatprep.subr.bf16.mxu0 %v400_v9  ;;  %v406_v20 = vpack.c.bf16 %v52_v17, %v50_v16  ;;  %v408_v21 = vpack.c.bf16 %v57_v19, %v55_v18  ;;  %v54_v22 = vld [vmem:[#allocation5 + $0x60] sm:$0xff]  ;;  %v56_v23 = vld [vmem:[#allocation5 + $0x70] sm:$0xff]  ;;  %v41_v25 = vld [vmem:[#allocation2] sm:$0xff] }
  0x2c   :  { %v410_v24 = vpack.c.bf16 %v56_v23, %v54_v22  ;;  %v58_v29 = vld [vmem:[%s628_s2] sm:$0x3]  ;;  %v158_v42 = vld [vmem:[#allocation5 + $0x88] sm:$0xff]  ;;  %v157_v44 = vld [vmem:[#allocation5 + $0x80] sm:$0xff]  ;;  %p514_p5 = por %p513_p4, %p512_p3 }
  0x2d   :  { %v63_v31 = vrot.slane %v58_v29, %v594_v28  ;;  %v67_v32 = vrot.slane %v58_v29, %v66_v30  ;;  %v160_v43 = vld [vmem:[#allocation5 + $0x98] sm:$0xff]  ;;  %v159_v46 = vld [vmem:[#allocation5 + $0x90] sm:$0xff]  ;;  %v162_v47 = vld [vmem:[#allocation5 + $0xa8] sm:$0xff] }
  0x2e   :  { %403 = vmatpush1.bf16.msra.mxu0 %v402_v14  ;;  %v412_v45 = vpack.c.bf16 %v160_v43, %v158_v42  ;;  %v164_v48 = vld [vmem:[#allocation5 + $0xb8] sm:$0xff]  ;;  %v414_v49 = vpack.c.bf16 %v159_v46, %v157_v44  ;;  %v161_v51 = vld [vmem:[#allocation5 + $0xa0] sm:$0xff]  ;;  %v163_v52 = vld [vmem:[#allocation5 + $0xb0] sm:$0xff]  ;;  %p515_p6 = pnand %p514_p5, %p508_p2 }
  0x2f   :  { %405 = vmatprep.subr.bf16.mxu0 %v404_v15  ;;  %v416_v50 = vpack.c.bf16 %v164_v48, %v162_v47  ;;  %v166_v53 = vld [vmem:[#allocation5 + $0xc8] sm:$0xff]  ;;  %v168_v54 = vld [vmem:[#allocation5 + $0xd8] sm:$0xff]  ;;  %v418_v55 = vpack.c.bf16 %v163_v52, %v161_v51  ;;  %v165_v57 = vld [vmem:[#allocation5 + $0xc0] sm:$0xff] }
  0x30   :  { %413 = vmatprep.subr.bf16.mxu1 %v412_v45  ;;  %v420_v56 = vpack.c.bf16 %v168_v54, %v166_v53  ;;  %v167_v58 = vld [vmem:[#allocation5 + $0xd0] sm:$0xff]  ;;  %v170_v59 = vld [vmem:[#allocation5 + $0xe8] sm:$0xff]  ;;  %v172_v60 = vld [vmem:[#allocation5 + $0xf8] sm:$0xff] }
  0x31   :  { %415 = vmatpush1.bf16.msra.mxu1 %v414_v49  ;;  %v422_v61 = vpack.c.bf16 %v167_v58, %v165_v57  ;;  %v424_v62 = vpack.c.bf16 %v172_v60, %v170_v59  ;;  %v169_v63 = vld [vmem:[#allocation5 + $0xe0] sm:$0xff]  ;;  %v392_v6 = vld [vmem:[%s628_s2 + $0x2] sm:$0x3]  ;;  %v275_v18 = vld [vmem:[#allocation5 + $0x108] sm:$0xff] }
  0x32   :  { %407 = vmatpush1.bf16.msra.mxu0 %v406_v20  ;;  %417 = vmatprep.subr.bf16.mxu1 %v416_v50  ;;  %v179_v7 = vrot.slane %v392_v6, %v594_v28  ;;  %v183_v8 = vrot.slane %v392_v6, %v66_v30  ;;  %v277_v19 = vld [vmem:[#allocation5 + $0x118] sm:$0xff]  ;;  %v274_v20 = vld [vmem:[#allocation5 + $0x100] sm:$0xff]  ;;  %v276_v22 = vld [vmem:[#allocation5 + $0x110] sm:$0xff] }
  0x33   :  { %409 = vmatprep.subr.bf16.mxu0 %v408_v21  ;;  %v428_v21 = vpack.c.bf16 %v277_v19, %v275_v18  ;;  %v279_v23 = vld [vmem:[#allocation5 + $0x128] sm:$0xff]  ;;  %v278_v27 = vld [vmem:[#allocation5 + $0x120] sm:$0xff]  ;;  %v280_v29 = vld [vmem:[#allocation5 + $0x130] sm:$0xff] }
  0x34   :  { %v283_v30 = vld [vmem:[#allocation5 + $0x148] sm:$0xff]  ;;  %v395_v47 = vld [vmem:[%s628_s2 + $0x4] sm:$0x3] }
  0x35   :  { %419 = vmatpush1.bf16.msra.mxu1 %v418_v55  ;;  %v371_v48 = vrot.slane %v395_v47, %v594_v28 }
  0x36   :  { %411 = vmatpush1.bf16.msra.mxu0 %v410_v24  ;;  %421 = vmatprep.subr.bf16.mxu1 %v420_v56  ;;  %v281_v24 = vld [vmem:[#allocation5 + $0x138] sm:$0xff] }
  0x37   :  { %v432_v26 = vpack.c.bf16 %v281_v24, %v279_v23  ;;  %429 = vmatprep.subr.bf16.mxu0 %v428_v21 }
  0x39   :  { %391 = vmatmul.mubr.msk.f32.vlgmr.msra.gmra.mrb[0].mxu0 %vm70_vm0, %v41_v25  ;;  %423 = vmatpush1.bf16.msra.mxu1 %v422_v61  ;;  %v430_v25 = vpack.c.bf16 %v276_v22, %v274_v20 }
  0x3a   :  { %359 = vmatprep.mubr.f32.mxu0 %v539_v0  ;;  %v171_v0 = vld [vmem:[#allocation5 + $0xf0] sm:$0xff]  ;;  %425 = vmatprep.subr.bf16.mxu1 %v424_v62 }
  0x3b   :  { %v426_v2 = vpack.c.bf16 %v171_v0, %v169_v63  ;;  %431 = vmatpush1.bf16.msra.mxu0 %v430_v25 }
  0x3c   :  { %433 = vmatprep.subr.bf16.mxu0 %v432_v26 }
  0x3d   :  { %427 = vmatpush1.bf16.msra.mxu1 %v426_v2 }
 0x10c   :  { %v140_v33 = vpop.f32.mrb[0].mxu0 }
 0x10d   :  { %v141_v34 = vadd.f32 %v140_v33, %v63_v31  ;;  %v142_v35 = vpop.f32.mrb[1].mxu0  ;;  %v285_v31 = vld [vmem:[#allocation5 + $0x158] sm:$0xff] }
 0x10e   :  { %v143_v36 = vadd.f32 %v142_v35, %v67_v32  ;;  %v434_v32 = vpack.c.bf16 %v280_v29, %v278_v27  ;;  %v436_v33 = vpack.c.bf16 %v285_v31, %v283_v30  ;;  %v284_v35 = vld [vmem:[#allocation5 + $0x150] sm:$0xff] }
 0x10f   :  { %451 = vtanh.f32 %v141_v34  ;;  %v282_v34 = vld [vmem:[#allocation5 + $0x140] sm:$0xff] }
 0x110   :  { %453 = vtanh.f32 %v143_v36  ;;  %v287_v36 = vld [vmem:[#allocation5 + $0x168] sm:$0xff]  ;;  %435 = vmatpush1.bf16.msra.mxu0 %v434_v32 }
 0x111   :  { %437 = vmatprep.subr.bf16.mxu0 %v436_v33 }
 0x119   :  { %v452_v37 = vpop.eup %451 }
 0x11a   :  { %v147_v38 = vmul.f32 0.5, %v452_v37  ;;  %v454_v40 = vpop.eup %453  ;;  %v289_v37 = vld [vmem:[#allocation5 + $0x178] sm:$0xff] }
 0x11c   :  { %v148_v39 = vadd.f32 0.5, %v147_v38  ;;  %v438_v38 = vpack.c.bf16 %v284_v35, %v282_v34 }
 0x11e   :  { %v149_v41 = vmul.f32 %v454_v40, %v148_v39  ;;  %v286_v40 = vld [vmem:[#allocation5 + $0x160] sm:$0xff]  ;;  %439 = vmatpush1.bf16.msra.mxu0 %v438_v38 }
 0x120   :  { %455 = vtanh.f32 %v149_v41  ;;  %v288_v41 = vld [vmem:[#allocation5 + $0x170] sm:$0xff] }
 0x121   :  { %v442_v43 = vpack.c.bf16 %v288_v41, %v286_v40 }
 0x12a   :  { %v456_v1 = vpop.eup %455 }
 0x12b   :  { %152 = vrot.lane.b32.xlu0 %v456_v1, %s540_s11 }
 0x19d   :  { %v153_v3 = vpop.permute.xlu0 %152 }
 0x19e   :  { %v155_v4 = vmul.f32 %v153_v3, %v148_v39  ;;  %v440_v39 = vpack.c.bf16 %v289_v37, %v287_v36 }
 0x1a0   :  { %187 = vrot.lane.b32.xlu0 %v155_v4, %s540_s11  ;;  %441 = vmatprep.subr.bf16.mxu0 %v440_v39 }
 0x1a1   :  { %443 = vmatpush1.bf16.msra.mxu0 %v442_v43 }
 0x212   :  { %v188_v5 = vpop.permute.xlu0 %187 }
 0x213   :  { %393 = vmatmul.mubr.msk.f32.vlgmr.msra.gmra.mrb[0].mxu1 %vm70_vm0, %v188_v5 }
 0x2e6   :  { %v257_v9 = vpop.f32.mrb[0].mxu1 }
 0x2e7   :  { %v258_v10 = vadd.f32 %v257_v9, %v179_v7  ;;  %v259_v11 = vpop.f32.mrb[1].mxu1 }
 0x2e8   :  { %v260_v12 = vadd.f32 %v259_v11, %v183_v8 }
 0x2e9   :  { %457 = vtanh.f32 %v258_v10 }
 0x2ea   :  { %459 = vtanh.f32 %v260_v12 }
 0x2f3   :  { %v458_v13 = vpop.eup %457 }
 0x2f4   :  { %v264_v14 = vmul.f32 0.5, %v458_v13  ;;  %v460_v16 = vpop.eup %459 }
 0x2f6   :  { %v265_v15 = vadd.f32 0.5, %v264_v14 }
 0x2f8   :  { %v266_v17 = vmul.f32 %v460_v16, %v265_v15 }
 0x2fa   :  { %461 = vtanh.f32 %v266_v17 }
 0x304   :  { %v462_v42 = vpop.eup %461 }
 0x305   :  { %269 = vrot.lane.b32.xlu1 %v462_v42, %s540_s11 }
 0x377   :  { %v270_v44 = vpop.permute.xlu1 %269 }
 0x378   :  { %v272_v45 = vmul.f32 %v270_v44, %v265_v15 }
 0x37a   :  { %291 = vrot.lane.b32.xlu1 %v272_v45, %s540_s11 }
 0x3ec   :  { %v292_v46 = vpop.permute.xlu1 %291 }
 0x3ed   :  { %394 = vmatmul.mubr.msk.f32.vlgmr.msra.gmra.mrb[2].mxu0 %vm70_vm0, %v292_v46 }
 0x4c0   :  { %v361_v49 = vpop.f32.mrb[2].mxu0 }
 0x4c1   :  { %v373_v50 = vadd.f32 %v371_v48, %v361_v49  ;;  %v363_v51 = vpop.f32.mrb[3].mxu0 }
 0x4c3   :  { %374 = vst [vmem:[#allocation7] sm:$0xff] %v373_v50 }
 0x4c4   :  { %518 = shalt.err (!%p515_p6)
}
 0x4c5   :  { %s519_s2 = scalar_lea.hbm %s629_s3, 128 }
 0x4c6   :  { %p520_p7 = scmp.ne.s32.totalorder %s629_s3, %s519_s2  ;;  %p523_p8 = scmp.lt.u32.totalorder %s519_s2, %s629_s3 }
 0x4c8   :  { %p525_p9 = pnand %p523_p8, %p520_p7 }
 0x4ca   :  { %528 = shalt.err (!%p525_p9)
}
 0x4cb   :  { %384 = dma.vmem_to_hbm [thread:$0]  %s382_s17, 128, %s629_s3, [#allocation4]  }
 0x4cc   :  { %533 = dma.done.wait [#allocation4], 128  }
 0x4cd   :  { %534 = vsyncadd [#allocation4], 4294967168 }
 0x4ce   :  { %388 = vsyncpa [#allocation3], 1 }
 0x4cf   :  { %389 = vsyncpa [#allocation6], 1 }
 0x4d0   :  { %390 = vsyncpa [#allocation4], 1 }

</bundles_post_ra>
